<compile_context>
chip_gen: v7x
topology: tpu7x:2x2x1
jax: 0.10.0
libtpu: 0.0.40
codegen_flags: <defaults>
</compile_context>

<pallas_src>
from functools import partial

import jax
import jax.numpy as jnp
from jax.experimental import pallas as pl
from jax.experimental.pallas import tpu as pltpu


def net_kernel(x_ref, w1_ref, b1_ref, w2_ref, b2_ref,   # inputs
               out_ref,                                  # single merged output (1, 2B, N_pad)
               *, inner_steps, beta1, beta2, thr1, thr2, num_inputs):
    x = x_ref[0]          # (B, num_inputs)
    w1 = w1_ref[...]      # (num_inputs, H)
    b1 = b1_ref[...]      # (1, H)
    w2 = w2_ref[...]      # (H, N_pad)  -- zero-padded lanes beyond num_outputs
    b2 = b2_ref[...]      # (1, N_pad)

    batch = x.shape[0]
    n_pad = w2.shape[1]

    # --- fc1: cur1 is identical every inner step -> compute once.
    # K is tiny (3): skip the MXU, use broadcast multiply-adds on the VPU.
    if num_inputs <= 8:
        cur1 = b1                                       # (1, H) -> broadcasts to (B, H)
        for k in range(num_inputs):
            cur1 = cur1 + x[:, k:k + 1] * w1[k:k + 1, :]
    else:
        cur1 = jnp.dot(x, w1, preferred_element_type=jnp.float32) + b1

    # --- Phase 1: mem1 recurrence (pure VPU); keep every step's state in vregs.
    mem1 = jnp.zeros_like(cur1 * jnp.zeros((batch, 1), jnp.float32))  # (B, H) zeros
    mem1_steps = []
    for _ in range(inner_steps):
        mem1 = beta1 * mem1 + cur1 - jnp.where(mem1 > thr1, thr1, 0.0)
        mem1_steps.append(mem1)
    mem1_stack = jnp.concatenate(mem1_steps, axis=0)    # (steps*B, H), stays in vregs

    # --- Phase 2: ONE MXU matmul computes fc2 for all steps (bias folded once).
    cur2_all = jnp.dot(mem1_stack, w2,
                       preferred_element_type=jnp.float32) + b2   # (steps*B, N_pad)

    # --- Phase 3: mem2 recurrence (pure VPU) over precomputed cur2 slices.
    mem2 = jnp.zeros((batch, n_pad), jnp.float32)
    for t in range(inner_steps):
        cur2 = cur2_all[t * batch:(t + 1) * batch, :]
        mem2 = beta2 * mem2 + cur2 - jnp.where(mem2 > thr2, thr2, 0.0)

    spk2 = (mem2 > thr2).astype(jnp.float32)

    # Single merged, lane-dense output: rows [0:B) = spk2, rows [B:2B) = mem2.
    out_ref[0] = jnp.concatenate([spk2, mem2], axis=0)


def net_forward_multi(x, w1, b1, w2, b2, *, beta1=0.5, beta2=0.5,
                      thr1=15.0, thr2=10.0, inner_steps=10):
    """Batched-launch forward.

    x:  (n_calls, B, num_inputs) -- n_calls independent forwards folded into the grid.
    w1: (num_hidden, num_inputs) torch layout; b1: (num_hidden,)
    w2: (num_outputs, num_hidden);              b2: (num_outputs,)
    Returns (spk2, mem2), each (n_calls, B, num_outputs).
    """
    n_calls, batch, num_inputs = x.shape
    num_hidden = w1.shape[0]
    num_outputs = w2.shape[0]

    # Lane-dense output width (multiple of 128).
    n_pad = ((num_outputs + 127) // 128) * 128

    # Glue: pre-transpose weights to [in, out]; zero-pad fc2 to n_pad lanes.
    x = jnp.asarray(x, jnp.float32)
    w1t = jnp.asarray(w1, jnp.float32).T                                    # (in, H)
    b1r = jnp.asarray(b1, jnp.float32).reshape(1, num_hidden)               # (1, H)
    w2t = jnp.zeros((num_hidden, n_pad), jnp.float32)
    w2t = w2t.at[:, :num_outputs].set(jnp.asarray(w2, jnp.float32).T)       # (H, N_pad)
    b2r = jnp.zeros((1, n_pad), jnp.float32)
    b2r = b2r.at[:, :num_outputs].set(jnp.asarray(b2, jnp.float32).reshape(1, num_outputs))

    kernel = partial(net_kernel, inner_steps=int(inner_steps),
                     beta1=float(beta1), beta2=float(beta2),
                     thr1=float(thr1), thr2=float(thr2),
                     num_inputs=int(num_inputs))

    out = pl.pallas_call(
        kernel,
        out_shape=jax.ShapeDtypeStruct((n_calls, 2 * batch, n_pad), jnp.float32),
        grid=(n_calls,),
        in_specs=[
            pl.BlockSpec((1, batch, num_inputs), lambda i: (i, 0, 0)),
            # Weights/biases: constant index_map -> resident in VMEM across the grid.
            pl.BlockSpec((num_inputs, num_hidden), lambda i: (0, 0)),
            pl.BlockSpec((1, num_hidden), lambda i: (0, 0)),
            pl.BlockSpec((num_hidden, n_pad), lambda i: (0, 0)),
            pl.BlockSpec((1, n_pad), lambda i: (0, 0)),
        ],
        out_specs=pl.BlockSpec((1, 2 * batch, n_pad), lambda i: (i, 0, 0)),
        # Calls are independent -> "parallel" shards the grid across both TCs on v7x.
        compiler_params=pltpu.CompilerParams(dimension_semantics=("parallel",)),
    )(x, w1t, b1r, w2t, b2r)

    spk2 = out[:, :batch, :num_outputs]
    mem2 = out[:, batch:, :num_outputs]
    return spk2, mem2


def net_forward(x, w1, b1, w2, b2, **kwargs):
    """Single-call forward. x: (B, num_inputs). Returns (spk2, mem2) of (B, num_outputs)."""
    spk2, mem2 = net_forward_multi(x[None], w1, b1, w2, b2, **kwargs)
    return spk2[0], mem2[0]


def _ref_forward(x, w1, b1, w2, b2, beta1=0.5, beta2=0.5,
                 thr1=15.0, thr2=10.0, inner_steps=10):
    """Pure-JAX reference mirroring the PyTorch/snnTorch forward."""
    mem1 = jnp.zeros((x.shape[0], w1.shape[0]), jnp.float32)
    mem2 = jnp.zeros((x.shape[0], w2.shape[0]), jnp.float32)
    for _ in range(inner_steps):
        cur1 = x @ w1.T + b1
        reset1 = (mem1 > thr1).astype(jnp.float32)
        mem1 = beta1 * mem1 + cur1 - reset1 * thr1
        cur2 = mem1 @ w2.T + b2
        reset2 = (mem2 > thr2).astype(jnp.float32)
        mem2 = beta2 * mem2 + cur2 - reset2 * thr2
    spk2 = (mem2 > thr2).astype(jnp.float32)
    return spk2, mem2


if __name__ == "__main__":
    # Lorenz-flavoured small shapes: 3-D state in, 3-D out, hidden=32, batch=8.
    batch, num_inputs, num_hidden, num_outputs = 8, 3, 32, 3
    n_calls = 4   # several independent forwards folded into one grid launch

    key = jax.random.PRNGKey(0)
    kx, kw1, kb1, kw2, kb2 = jax.random.split(key, 5)

    # Deterministic PyTorch-Linear-style init: U(-1/sqrt(fan_in), 1/sqrt(fan_in)).
    lim1 = 1.0 / (num_inputs ** 0.5)
    lim2 = 1.0 / (num_hidden ** 0.5)
    w1 = jax.random.uniform(kw1, (num_hidden, num_inputs), jnp.float32, -lim1, lim1)
    b1 = jax.random.uniform(kb1, (num_hidden,), jnp.float32, -lim1, lim1)
    w2 = jax.random.uniform(kw2, (num_outputs, num_hidden), jnp.float32, -lim2, lim2)
    b2 = jax.random.uniform(kb2, (num_outputs,), jnp.float32, -lim2, lim2)

    # Inputs scaled to Lorenz-attractor magnitudes so membranes can cross threshold.
    x_multi = jax.random.uniform(kx, (n_calls, batch, num_inputs), jnp.float32,
                                 -1.0, 1.0) * 20.0

    thr2 = 10.0

    # --- Single-call path -------------------------------------------------------
    x = x_multi[0]
    spk2, mem2 = net_forward(x, w1, b1, w2, b2)
    jax.block_until_ready((spk2, mem2))

    spk2_ref, mem2_ref = _ref_forward(x, w1, b1, w2, b2)
    assert spk2.shape == (batch, num_outputs) and mem2.shape == (batch, num_outputs)
    assert jnp.allclose(mem2, mem2_ref, atol=1e-3, rtol=1e-3)
    # spk2 must be internally consistent with the kernel's own mem2 ...
    assert jnp.array_equal(spk2, (mem2 > thr2).astype(jnp.float32))
    # ... and match the reference wherever mem2_ref isn't sitting on the threshold.
    safe = jnp.abs(mem2_ref - thr2) > 1e-3
    assert bool(jnp.all(jnp.where(safe, spk2 == spk2_ref, True)))

    # --- Batched-launch path (grid over independent forwards) --------------------
    spk2_m, mem2_m = net_forward_multi(x_multi, w1, b1, w2, b2)
    jax.block_until_ready((spk2_m, mem2_m))
    assert spk2_m.shape == (n_calls, batch, num_outputs)
    for c in range(n_calls):
        s_ref, m_ref = _ref_forward(x_multi[c], w1, b1, w2, b2)
        assert jnp.allclose(mem2_m[c], m_ref, atol=1e-3, rtol=1e-3)
        assert jnp.array_equal(spk2_m[c], (mem2_m[c] > thr2).astype(jnp.float32))
        safe_c = jnp.abs(m_ref - thr2) > 1e-3
        assert bool(jnp.all(jnp.where(safe_c, spk2_m[c] == s_ref, True)))

    print("KERNEL_OK")
</pallas_src>

<mosaic_0001>
module attributes {stable_mosaic.version = 11 : i64} {
  func.func @net_kernel(%arg0: i32, %arg1: memref<1x8x3xf32, #tpu.memory_space<vmem>>, %arg2: memref<3x32xf32, #tpu.memory_space<vmem>>, %arg3: memref<1x32xf32, #tpu.memory_space<vmem>>, %arg4: memref<32x128xf32, #tpu.memory_space<vmem>>, %arg5: memref<1x128xf32, #tpu.memory_space<vmem>>, %arg6: memref<1x16x128xf32, #tpu.memory_space<vmem>>) attributes {dimension_semantics = [#tpu.dimension_semantics<parallel>], iteration_bounds = array<i64: 1>, scalar_prefetch = 0 : i64, scratch_operands = 0 : i64, tpu.core_type = #tpu.core_type<tc>, window_params = [{transform_indices = @transform_0, window_bounds = array<i64: 1, 8, 3>}, {pipeline_mode = #tpu.pipeline_mode<synchronous>, transform_indices = @transform_1, window_bounds = array<i64: 3, 32>}, {pipeline_mode = #tpu.pipeline_mode<synchronous>, transform_indices = @transform_2, window_bounds = array<i64: 1, 32>}, {pipeline_mode = #tpu.pipeline_mode<synchronous>, transform_indices = @transform_3, window_bounds = array<i64: 32, 128>}, {pipeline_mode = #tpu.pipeline_mode<synchronous>, transform_indices = @transform_4, window_bounds = array<i64: 1, 128>}, {transform_indices = @transform_5, window_bounds = array<i64: 1, 16, 128>}]} {
    %c0 = arith.constant 0 : index
    %c0_0 = arith.constant 0 : index
    %c0_1 = arith.constant 0 : index
    %0 = vector.load %arg1[%c0, %c0_0, %c0_1] : memref<1x8x3xf32, #tpu.memory_space<vmem>>, vector<1x8x3xf32>
    %1 = vector.shape_cast %0 : vector<1x8x3xf32> to vector<8x3xf32>
    %c0_2 = arith.constant 0 : index
    %c0_3 = arith.constant 0 : index
    %2 = vector.load %arg2[%c0_2, %c0_3] : memref<3x32xf32, #tpu.memory_space<vmem>>, vector<3x32xf32>
    %c0_4 = arith.constant 0 : index
    %c0_5 = arith.constant 0 : index
    %3 = vector.load %arg3[%c0_4, %c0_5] : memref<1x32xf32, #tpu.memory_space<vmem>>, vector<1x32xf32>
    %c0_6 = arith.constant 0 : index
    %c0_7 = arith.constant 0 : index
    %4 = vector.load %arg4[%c0_6, %c0_7] : memref<32x128xf32, #tpu.memory_space<vmem>>, vector<32x128xf32>
    %c0_8 = arith.constant 0 : index
    %c0_9 = arith.constant 0 : index
    %5 = vector.load %arg5[%c0_8, %c0_9] : memref<1x128xf32, #tpu.memory_space<vmem>>, vector<1x128xf32>
    %6 = vector.extract_strided_slice %1 {offsets = [0, 0], sizes = [8, 1], strides = [1, 1]} : vector<8x3xf32> to vector<8x1xf32>
    %7 = vector.extract_strided_slice %2 {offsets = [0, 0], sizes = [1, 32], strides = [1, 1]} : vector<3x32xf32> to vector<1x32xf32>
    %8 = vector.broadcast %6 : vector<8x1xf32> to vector<8x32xf32>
    %9 = vector.broadcast %7 : vector<1x32xf32> to vector<8x32xf32>
    %10 = arith.mulf %8, %9 : vector<8x32xf32>
    %11 = vector.broadcast %3 : vector<1x32xf32> to vector<8x32xf32>
    %12 = arith.addf %11, %10 : vector<8x32xf32>
    %13 = vector.extract_strided_slice %1 {offsets = [0, 1], sizes = [8, 1], strides = [1, 1]} : vector<8x3xf32> to vector<8x1xf32>
    %14 = vector.extract_strided_slice %2 {offsets = [1, 0], sizes = [1, 32], strides = [1, 1]} : vector<3x32xf32> to vector<1x32xf32>
    %15 = vector.broadcast %13 : vector<8x1xf32> to vector<8x32xf32>
    %16 = vector.broadcast %14 : vector<1x32xf32> to vector<8x32xf32>
    %17 = arith.mulf %15, %16 : vector<8x32xf32>
    %18 = arith.addf %12, %17 : vector<8x32xf32>
    %19 = vector.extract_strided_slice %1 {offsets = [0, 2], sizes = [8, 1], strides = [1, 1]} : vector<8x3xf32> to vector<8x1xf32>
    %20 = vector.extract_strided_slice %2 {offsets = [2, 0], sizes = [1, 32], strides = [1, 1]} : vector<3x32xf32> to vector<1x32xf32>
    %21 = vector.broadcast %19 : vector<8x1xf32> to vector<8x32xf32>
    %22 = vector.broadcast %20 : vector<1x32xf32> to vector<8x32xf32>
    %23 = arith.mulf %21, %22 : vector<8x32xf32>
    %24 = arith.addf %18, %23 : vector<8x32xf32>
    %cst = arith.constant 0.000000e+00 : f32
    %25 = vector.broadcast %cst : f32 to vector<8x32xf32>
    %cst_10 = arith.constant 5.000000e-01 : f32
    %26 = vector.broadcast %cst_10 : f32 to vector<8x32xf32>
    %27 = arith.mulf %26, %25 : vector<8x32xf32>
    %28 = arith.addf %27, %24 : vector<8x32xf32>
    %cst_11 = arith.constant 1.500000e+01 : f32
    %29 = vector.broadcast %cst_11 : f32 to vector<8x32xf32>
    %30 = arith.cmpf ogt, %25, %29 : vector<8x32xf32>
    %cst_12 = arith.constant 1.500000e+01 : f32
    %cst_13 = arith.constant 0.000000e+00 : f32
    %31 = vector.broadcast %cst_12 : f32 to vector<8x32xf32>
    %32 = vector.broadcast %cst_13 : f32 to vector<8x32xf32>
    %33 = arith.select %30, %31, %32 : vector<8x32xi1>, vector<8x32xf32>
    %34 = arith.subf %28, %33 : vector<8x32xf32>
    %cst_14 = arith.constant 5.000000e-01 : f32
    %35 = vector.broadcast %cst_14 : f32 to vector<8x32xf32>
    %36 = arith.mulf %35, %34 : vector<8x32xf32>
    %37 = arith.addf %36, %24 : vector<8x32xf32>
    %cst_15 = arith.constant 1.500000e+01 : f32
    %38 = vector.broadcast %cst_15 : f32 to vector<8x32xf32>
    %39 = arith.cmpf ogt, %34, %38 : vector<8x32xf32>
    %cst_16 = arith.constant 1.500000e+01 : f32
    %cst_17 = arith.constant 0.000000e+00 : f32
    %40 = vector.broadcast %cst_16 : f32 to vector<8x32xf32>
    %41 = vector.broadcast %cst_17 : f32 to vector<8x32xf32>
    %42 = arith.select %39, %40, %41 : vector<8x32xi1>, vector<8x32xf32>
    %43 = arith.subf %37, %42 : vector<8x32xf32>
    %cst_18 = arith.constant 5.000000e-01 : f32
    %44 = vector.broadcast %cst_18 : f32 to vector<8x32xf32>
    %45 = arith.mulf %44, %43 : vector<8x32xf32>
    %46 = arith.addf %45, %24 : vector<8x32xf32>
    %cst_19 = arith.constant 1.500000e+01 : f32
    %47 = vector.broadcast %cst_19 : f32 to vector<8x32xf32>
    %48 = arith.cmpf ogt, %43, %47 : vector<8x32xf32>
    %cst_20 = arith.constant 1.500000e+01 : f32
    %cst_21 = arith.constant 0.000000e+00 : f32
    %49 = vector.broadcast %cst_20 : f32 to vector<8x32xf32>
    %50 = vector.broadcast %cst_21 : f32 to vector<8x32xf32>
    %51 = arith.select %48, %49, %50 : vector<8x32xi1>, vector<8x32xf32>
    %52 = arith.subf %46, %51 : vector<8x32xf32>
    %cst_22 = arith.constant 5.000000e-01 : f32
    %53 = vector.broadcast %cst_22 : f32 to vector<8x32xf32>
    %54 = arith.mulf %53, %52 : vector<8x32xf32>
    %55 = arith.addf %54, %24 : vector<8x32xf32>
    %cst_23 = arith.constant 1.500000e+01 : f32
    %56 = vector.broadcast %cst_23 : f32 to vector<8x32xf32>
    %57 = arith.cmpf ogt, %52, %56 : vector<8x32xf32>
    %cst_24 = arith.constant 1.500000e+01 : f32
    %cst_25 = arith.constant 0.000000e+00 : f32
    %58 = vector.broadcast %cst_24 : f32 to vector<8x32xf32>
    %59 = vector.broadcast %cst_25 : f32 to vector<8x32xf32>
    %60 = arith.select %57, %58, %59 : vector<8x32xi1>, vector<8x32xf32>
    %61 = arith.subf %55, %60 : vector<8x32xf32>
    %cst_26 = arith.constant 5.000000e-01 : f32
    %62 = vector.broadcast %cst_26 : f32 to vector<8x32xf32>
    %63 = arith.mulf %62, %61 : vector<8x32xf32>
    %64 = arith.addf %63, %24 : vector<8x32xf32>
    %cst_27 = arith.constant 1.500000e+01 : f32
    %65 = vector.broadcast %cst_27 : f32 to vector<8x32xf32>
    %66 = arith.cmpf ogt, %61, %65 : vector<8x32xf32>
    %cst_28 = arith.constant 1.500000e+01 : f32
    %cst_29 = arith.constant 0.000000e+00 : f32
    %67 = vector.broadcast %cst_28 : f32 to vector<8x32xf32>
    %68 = vector.broadcast %cst_29 : f32 to vector<8x32xf32>
    %69 = arith.select %66, %67, %68 : vector<8x32xi1>, vector<8x32xf32>
    %70 = arith.subf %64, %69 : vector<8x32xf32>
    %cst_30 = arith.constant 5.000000e-01 : f32
    %71 = vector.broadcast %cst_30 : f32 to vector<8x32xf32>
    %72 = arith.mulf %71, %70 : vector<8x32xf32>
    %73 = arith.addf %72, %24 : vector<8x32xf32>
    %cst_31 = arith.constant 1.500000e+01 : f32
    %74 = vector.broadcast %cst_31 : f32 to vector<8x32xf32>
    %75 = arith.cmpf ogt, %70, %74 : vector<8x32xf32>
    %cst_32 = arith.constant 1.500000e+01 : f32
    %cst_33 = arith.constant 0.000000e+00 : f32
    %76 = vector.broadcast %cst_32 : f32 to vector<8x32xf32>
    %77 = vector.broadcast %cst_33 : f32 to vector<8x32xf32>
    %78 = arith.select %75, %76, %77 : vector<8x32xi1>, vector<8x32xf32>
    %79 = arith.subf %73, %78 : vector<8x32xf32>
    %cst_34 = arith.constant 5.000000e-01 : f32
    %80 = vector.broadcast %cst_34 : f32 to vector<8x32xf32>
    %81 = arith.mulf %80, %79 : vector<8x32xf32>
    %82 = arith.addf %81, %24 : vector<8x32xf32>
    %cst_35 = arith.constant 1.500000e+01 : f32
    %83 = vector.broadcast %cst_35 : f32 to vector<8x32xf32>
    %84 = arith.cmpf ogt, %79, %83 : vector<8x32xf32>
    %cst_36 = arith.constant 1.500000e+01 : f32
    %cst_37 = arith.constant 0.000000e+00 : f32
    %85 = vector.broadcast %cst_36 : f32 to vector<8x32xf32>
    %86 = vector.broadcast %cst_37 : f32 to vector<8x32xf32>
    %87 = arith.select %84, %85, %86 : vector<8x32xi1>, vector<8x32xf32>
    %88 = arith.subf %82, %87 : vector<8x32xf32>
    %cst_38 = arith.constant 5.000000e-01 : f32
    %89 = vector.broadcast %cst_38 : f32 to vector<8x32xf32>
    %90 = arith.mulf %89, %88 : vector<8x32xf32>
    %91 = arith.addf %90, %24 : vector<8x32xf32>
    %cst_39 = arith.constant 1.500000e+01 : f32
    %92 = vector.broadcast %cst_39 : f32 to vector<8x32xf32>
    %93 = arith.cmpf ogt, %88, %92 : vector<8x32xf32>
    %cst_40 = arith.constant 1.500000e+01 : f32
    %cst_41 = arith.constant 0.000000e+00 : f32
    %94 = vector.broadcast %cst_40 : f32 to vector<8x32xf32>
    %95 = vector.broadcast %cst_41 : f32 to vector<8x32xf32>
    %96 = arith.select %93, %94, %95 : vector<8x32xi1>, vector<8x32xf32>
    %97 = arith.subf %91, %96 : vector<8x32xf32>
    %cst_42 = arith.constant 5.000000e-01 : f32
    %98 = vector.broadcast %cst_42 : f32 to vector<8x32xf32>
    %99 = arith.mulf %98, %97 : vector<8x32xf32>
    %100 = arith.addf %99, %24 : vector<8x32xf32>
    %cst_43 = arith.constant 1.500000e+01 : f32
    %101 = vector.broadcast %cst_43 : f32 to vector<8x32xf32>
    %102 = arith.cmpf ogt, %97, %101 : vector<8x32xf32>
    %cst_44 = arith.constant 1.500000e+01 : f32
    %cst_45 = arith.constant 0.000000e+00 : f32
    %103 = vector.broadcast %cst_44 : f32 to vector<8x32xf32>
    %104 = vector.broadcast %cst_45 : f32 to vector<8x32xf32>
    %105 = arith.select %102, %103, %104 : vector<8x32xi1>, vector<8x32xf32>
    %106 = arith.subf %100, %105 : vector<8x32xf32>
    %cst_46 = arith.constant 5.000000e-01 : f32
    %107 = vector.broadcast %cst_46 : f32 to vector<8x32xf32>
    %108 = arith.mulf %107, %106 : vector<8x32xf32>
    %109 = arith.addf %108, %24 : vector<8x32xf32>
    %cst_47 = arith.constant 1.500000e+01 : f32
    %110 = vector.broadcast %cst_47 : f32 to vector<8x32xf32>
    %111 = arith.cmpf ogt, %106, %110 : vector<8x32xf32>
    %cst_48 = arith.constant 1.500000e+01 : f32
    %cst_49 = arith.constant 0.000000e+00 : f32
    %112 = vector.broadcast %cst_48 : f32 to vector<8x32xf32>
    %113 = vector.broadcast %cst_49 : f32 to vector<8x32xf32>
    %114 = arith.select %111, %112, %113 : vector<8x32xi1>, vector<8x32xf32>
    %115 = arith.subf %109, %114 : vector<8x32xf32>
    %116 = tpu.concatenate %34, %43, %52, %61, %70, %79, %88, %97, %106, %115 in 0 : vector<8x32xf32>, vector<8x32xf32>, vector<8x32xf32>, vector<8x32xf32>, vector<8x32xf32>, vector<8x32xf32>, vector<8x32xf32>, vector<8x32xf32>, vector<8x32xf32>, vector<8x32xf32> -> vector<80x32xf32>
    %cst_50 = arith.constant dense<0.000000e+00> : vector<80x128xf32>
    %117 = tpu.matmul %116, %4, %cst_50 {dimension_numbers = #tpu.dot_dimension_numbers<[1], [0], [0], [1], [0, 0, 1, 1], [], []>} : vector<80x32xf32>, vector<32x128xf32>, vector<80x128xf32> -> vector<80x128xf32>
    %118 = vector.broadcast %5 : vector<1x128xf32> to vector<80x128xf32>
    %119 = arith.addf %117, %118 : vector<80x128xf32>
    %cst_51 = arith.constant 0.000000e+00 : f32
    %120 = vector.broadcast %cst_51 : f32 to vector<8x128xf32>
    %121 = vector.extract_strided_slice %119 {offsets = [0, 0], sizes = [8, 128], strides = [1, 1]} : vector<80x128xf32> to vector<8x128xf32>
    %cst_52 = arith.constant 5.000000e-01 : f32
    %122 = vector.broadcast %cst_52 : f32 to vector<8x128xf32>
    %123 = arith.mulf %122, %120 : vector<8x128xf32>
    %124 = arith.addf %123, %121 : vector<8x128xf32>
    %cst_53 = arith.constant 1.000000e+01 : f32
    %125 = vector.broadcast %cst_53 : f32 to vector<8x128xf32>
    %126 = arith.cmpf ogt, %120, %125 : vector<8x128xf32>
    %cst_54 = arith.constant 1.000000e+01 : f32
    %cst_55 = arith.constant 0.000000e+00 : f32
    %127 = vector.broadcast %cst_54 : f32 to vector<8x128xf32>
    %128 = vector.broadcast %cst_55 : f32 to vector<8x128xf32>
    %129 = arith.select %126, %127, %128 : vector<8x128xi1>, vector<8x128xf32>
    %130 = arith.subf %124, %129 : vector<8x128xf32>
    %131 = vector.extract_strided_slice %119 {offsets = [8, 0], sizes = [8, 128], strides = [1, 1]} : vector<80x128xf32> to vector<8x128xf32>
    %cst_56 = arith.constant 5.000000e-01 : f32
    %132 = vector.broadcast %cst_56 : f32 to vector<8x128xf32>
    %133 = arith.mulf %132, %130 : vector<8x128xf32>
    %134 = arith.addf %133, %131 : vector<8x128xf32>
    %cst_57 = arith.constant 1.000000e+01 : f32
    %135 = vector.broadcast %cst_57 : f32 to vector<8x128xf32>
    %136 = arith.cmpf ogt, %130, %135 : vector<8x128xf32>
    %cst_58 = arith.constant 1.000000e+01 : f32
    %cst_59 = arith.constant 0.000000e+00 : f32
    %137 = vector.broadcast %cst_58 : f32 to vector<8x128xf32>
    %138 = vector.broadcast %cst_59 : f32 to vector<8x128xf32>
    %139 = arith.select %136, %137, %138 : vector<8x128xi1>, vector<8x128xf32>
    %140 = arith.subf %134, %139 : vector<8x128xf32>
    %141 = vector.extract_strided_slice %119 {offsets = [16, 0], sizes = [8, 128], strides = [1, 1]} : vector<80x128xf32> to vector<8x128xf32>
    %cst_60 = arith.constant 5.000000e-01 : f32
    %142 = vector.broadcast %cst_60 : f32 to vector<8x128xf32>
    %143 = arith.mulf %142, %140 : vector<8x128xf32>
    %144 = arith.addf %143, %141 : vector<8x128xf32>
    %cst_61 = arith.constant 1.000000e+01 : f32
    %145 = vector.broadcast %cst_61 : f32 to vector<8x128xf32>
    %146 = arith.cmpf ogt, %140, %145 : vector<8x128xf32>
    %cst_62 = arith.constant 1.000000e+01 : f32
    %cst_63 = arith.constant 0.000000e+00 : f32
    %147 = vector.broadcast %cst_62 : f32 to vector<8x128xf32>
    %148 = vector.broadcast %cst_63 : f32 to vector<8x128xf32>
    %149 = arith.select %146, %147, %148 : vector<8x128xi1>, vector<8x128xf32>
    %150 = arith.subf %144, %149 : vector<8x128xf32>
    %151 = vector.extract_strided_slice %119 {offsets = [24, 0], sizes = [8, 128], strides = [1, 1]} : vector<80x128xf32> to vector<8x128xf32>
    %cst_64 = arith.constant 5.000000e-01 : f32
    %152 = vector.broadcast %cst_64 : f32 to vector<8x128xf32>
    %153 = arith.mulf %152, %150 : vector<8x128xf32>
    %154 = arith.addf %153, %151 : vector<8x128xf32>
    %cst_65 = arith.constant 1.000000e+01 : f32
    %155 = vector.broadcast %cst_65 : f32 to vector<8x128xf32>
    %156 = arith.cmpf ogt, %150, %155 : vector<8x128xf32>
    %cst_66 = arith.constant 1.000000e+01 : f32
    %cst_67 = arith.constant 0.000000e+00 : f32
    %157 = vector.broadcast %cst_66 : f32 to vector<8x128xf32>
    %158 = vector.broadcast %cst_67 : f32 to vector<8x128xf32>
    %159 = arith.select %156, %157, %158 : vector<8x128xi1>, vector<8x128xf32>
    %160 = arith.subf %154, %159 : vector<8x128xf32>
    %161 = vector.extract_strided_slice %119 {offsets = [32, 0], sizes = [8, 128], strides = [1, 1]} : vector<80x128xf32> to vector<8x128xf32>
    %cst_68 = arith.constant 5.000000e-01 : f32
    %162 = vector.broadcast %cst_68 : f32 to vector<8x128xf32>
    %163 = arith.mulf %162, %160 : vector<8x128xf32>
    %164 = arith.addf %163, %161 : vector<8x128xf32>
    %cst_69 = arith.constant 1.000000e+01 : f32
    %165 = vector.broadcast %cst_69 : f32 to vector<8x128xf32>
    %166 = arith.cmpf ogt, %160, %165 : vector<8x128xf32>
    %cst_70 = arith.constant 1.000000e+01 : f32
    %cst_71 = arith.constant 0.000000e+00 : f32
    %167 = vector.broadcast %cst_70 : f32 to vector<8x128xf32>
    %168 = vector.broadcast %cst_71 : f32 to vector<8x128xf32>
    %169 = arith.select %166, %167, %168 : vector<8x128xi1>, vector<8x128xf32>
    %170 = arith.subf %164, %169 : vector<8x128xf32>
    %171 = vector.extract_strided_slice %119 {offsets = [40, 0], sizes = [8, 128], strides = [1, 1]} : vector<80x128xf32> to vector<8x128xf32>
    %cst_72 = arith.constant 5.000000e-01 : f32
    %172 = vector.broadcast %cst_72 : f32 to vector<8x128xf32>
    %173 = arith.mulf %172, %170 : vector<8x128xf32>
    %174 = arith.addf %173, %171 : vector<8x128xf32>
    %cst_73 = arith.constant 1.000000e+01 : f32
    %175 = vector.broadcast %cst_73 : f32 to vector<8x128xf32>
    %176 = arith.cmpf ogt, %170, %175 : vector<8x128xf32>
    %cst_74 = arith.constant 1.000000e+01 : f32
    %cst_75 = arith.constant 0.000000e+00 : f32
    %177 = vector.broadcast %cst_74 : f32 to vector<8x128xf32>
    %178 = vector.broadcast %cst_75 : f32 to vector<8x128xf32>
    %179 = arith.select %176, %177, %178 : vector<8x128xi1>, vector<8x128xf32>
    %180 = arith.subf %174, %179 : vector<8x128xf32>
    %181 = vector.extract_strided_slice %119 {offsets = [48, 0], sizes = [8, 128], strides = [1, 1]} : vector<80x128xf32> to vector<8x128xf32>
    %cst_76 = arith.constant 5.000000e-01 : f32
    %182 = vector.broadcast %cst_76 : f32 to vector<8x128xf32>
    %183 = arith.mulf %182, %180 : vector<8x128xf32>
    %184 = arith.addf %183, %181 : vector<8x128xf32>
    %cst_77 = arith.constant 1.000000e+01 : f32
    %185 = vector.broadcast %cst_77 : f32 to vector<8x128xf32>
    %186 = arith.cmpf ogt, %180, %185 : vector<8x128xf32>
    %cst_78 = arith.constant 1.000000e+01 : f32
    %cst_79 = arith.constant 0.000000e+00 : f32
    %187 = vector.broadcast %cst_78 : f32 to vector<8x128xf32>
    %188 = vector.broadcast %cst_79 : f32 to vector<8x128xf32>
    %189 = arith.select %186, %187, %188 : vector<8x128xi1>, vector<8x128xf32>
    %190 = arith.subf %184, %189 : vector<8x128xf32>
    %191 = vector.extract_strided_slice %119 {offsets = [56, 0], sizes = [8, 128], strides = [1, 1]} : vector<80x128xf32> to vector<8x128xf32>
    %cst_80 = arith.constant 5.000000e-01 : f32
    %192 = vector.broadcast %cst_80 : f32 to vector<8x128xf32>
    %193 = arith.mulf %192, %190 : vector<8x128xf32>
    %194 = arith.addf %193, %191 : vector<8x128xf32>
    %cst_81 = arith.constant 1.000000e+01 : f32
    %195 = vector.broadcast %cst_81 : f32 to vector<8x128xf32>
    %196 = arith.cmpf ogt, %190, %195 : vector<8x128xf32>
    %cst_82 = arith.constant 1.000000e+01 : f32
    %cst_83 = arith.constant 0.000000e+00 : f32
    %197 = vector.broadcast %cst_82 : f32 to vector<8x128xf32>
    %198 = vector.broadcast %cst_83 : f32 to vector<8x128xf32>
    %199 = arith.select %196, %197, %198 : vector<8x128xi1>, vector<8x128xf32>
    %200 = arith.subf %194, %199 : vector<8x128xf32>
    %201 = vector.extract_strided_slice %119 {offsets = [64, 0], sizes = [8, 128], strides = [1, 1]} : vector<80x128xf32> to vector<8x128xf32>
    %cst_84 = arith.constant 5.000000e-01 : f32
    %202 = vector.broadcast %cst_84 : f32 to vector<8x128xf32>
    %203 = arith.mulf %202, %200 : vector<8x128xf32>
    %204 = arith.addf %203, %201 : vector<8x128xf32>
    %cst_85 = arith.constant 1.000000e+01 : f32
    %205 = vector.broadcast %cst_85 : f32 to vector<8x128xf32>
    %206 = arith.cmpf ogt, %200, %205 : vector<8x128xf32>
    %cst_86 = arith.constant 1.000000e+01 : f32
    %cst_87 = arith.constant 0.000000e+00 : f32
    %207 = vector.broadcast %cst_86 : f32 to vector<8x128xf32>
    %208 = vector.broadcast %cst_87 : f32 to vector<8x128xf32>
    %209 = arith.select %206, %207, %208 : vector<8x128xi1>, vector<8x128xf32>
    %210 = arith.subf %204, %209 : vector<8x128xf32>
    %211 = vector.extract_strided_slice %119 {offsets = [72, 0], sizes = [8, 128], strides = [1, 1]} : vector<80x128xf32> to vector<8x128xf32>
    %cst_88 = arith.constant 5.000000e-01 : f32
    %212 = vector.broadcast %cst_88 : f32 to vector<8x128xf32>
    %213 = arith.mulf %212, %210 : vector<8x128xf32>
    %214 = arith.addf %213, %211 : vector<8x128xf32>
    %cst_89 = arith.constant 1.000000e+01 : f32
    %215 = vector.broadcast %cst_89 : f32 to vector<8x128xf32>
    %216 = arith.cmpf ogt, %210, %215 : vector<8x128xf32>
    %cst_90 = arith.constant 1.000000e+01 : f32
    %cst_91 = arith.constant 0.000000e+00 : f32
    %217 = vector.broadcast %cst_90 : f32 to vector<8x128xf32>
    %218 = vector.broadcast %cst_91 : f32 to vector<8x128xf32>
    %219 = arith.select %216, %217, %218 : vector<8x128xi1>, vector<8x128xf32>
    %220 = arith.subf %214, %219 : vector<8x128xf32>
    %cst_92 = arith.constant 1.000000e+01 : f32
    %221 = vector.broadcast %cst_92 : f32 to vector<8x128xf32>
    %222 = arith.cmpf ogt, %220, %221 : vector<8x128xf32>
    %223 = arith.extui %222 : vector<8x128xi1> to vector<8x128xi32>
    %224 = arith.sitofp %223 : vector<8x128xi32> to vector<8x128xf32>
    %225 = tpu.concatenate %224, %220 in 0 : vector<8x128xf32>, vector<8x128xf32> -> vector<16x128xf32>
    %c0_93 = arith.constant 0 : index
    %c0_94 = arith.constant 0 : index
    %c0_95 = arith.constant 0 : index
    %226 = vector.load %arg6[%c0_93, %c0_94, %c0_95] : memref<1x16x128xf32, #tpu.memory_space<vmem>>, vector<1x16x128xf32>
    %227 = vector.shape_cast %226 : vector<1x16x128xf32> to vector<16x128xf32>
    %228 = vector.shape_cast %225 : vector<16x128xf32> to vector<1x16x128xf32>
    tpu.vector_store %arg6[%c0_93, %c0_94, %c0_95], %228 {strides = array<i32>} : memref<1x16x128xf32, #tpu.memory_space<vmem>>, vector<1x16x128xf32>,
    return
  }
  func.func @transform_0(%arg0: i32) -> (i32, i32, i32) {
    %c0_i32 = arith.constant 0 : i32
    %c0_i32_0 = arith.constant 0 : i32
    %c0_i32_1 = arith.constant 0 : i32
    return %arg0, %c0_i32, %c0_i32_0 : i32, i32, i32
  }
  func.func @transform_1(%arg0: i32) -> (i32, i32) {
    %c0_i32 = arith.constant 0 : i32
    %c0_i32_0 = arith.constant 0 : i32
    %c0_i32_1 = arith.constant 0 : i32
    return %c0_i32, %c0_i32_0 : i32, i32
  }
  func.func @transform_2(%arg0: i32) -> (i32, i32) {
    %c0_i32 = arith.constant 0 : i32
    %c0_i32_0 = arith.constant 0 : i32
    %c0_i32_1 = arith.constant 0 : i32
    return %c0_i32, %c0_i32_0 : i32, i32
  }
  func.func @transform_3(%arg0: i32) -> (i32, i32) {
    %c0_i32 = arith.constant 0 : i32
    %c0_i32_0 = arith.constant 0 : i32
    %c0_i32_1 = arith.constant 0 : i32
    return %c0_i32, %c0_i32_0 : i32, i32
  }
  func.func @transform_4(%arg0: i32) -> (i32, i32) {
    %c0_i32 = arith.constant 0 : i32
    %c0_i32_0 = arith.constant 0 : i32
    %c0_i32_1 = arith.constant 0 : i32
    return %c0_i32, %c0_i32_0 : i32, i32
  }
  func.func @transform_5(%arg0: i32) -> (i32, i32, i32) {
    %c0_i32 = arith.constant 0 : i32
    %c0_i32_0 = arith.constant 0 : i32
    %c0_i32_1 = arith.constant 0 : i32
    return %arg0, %c0_i32, %c0_i32_0 : i32, i32, i32
  }
}

</mosaic_0001>

<bundles_post_ra>
// kernel: tpu_custom_call.1
= control target key start
LH: loop header
LB: loop body
LE: loop exit
PB: predicated region body
PF: predicated region fallthrough
CT: control target
= control target key end

     0   :  { %10 = vsyncpa [#allocation3], 0  ;;  %s583_s0 = inlined_call_operand.vmem [shape: f32[1,8,3], index: 0, kind: input, shape index: {}]   ;;  %s584_s1 = inlined_call_operand.vmem [shape: f32[3,32], index: 1, kind: input, shape index: {}]   ;;  %s585_s2 = inlined_call_operand.vmem [shape: f32[1,32], index: 2, kind: input, shape index: {}]   ;;  %s586_s3 = inlined_call_operand.hbm [shape: f32[32,128], index: 3, kind: input, shape index: {}]   ;;  %s587_s4 = inlined_call_operand.vmem [shape: f32[1,128], index: 4, kind: input, shape index: {}]   ;;  %s588_s5 = inlined_call_operand.hbm [shape: f32[1,16,128], index: 5, kind: output, shape index: {}]  }
   0x1   :  { %11 = vsyncpa [#allocation4], 0  ;;  %s474_s18 = smov [#allocation2]   ;;  %s426_s22 = scalar_lea.hbm %s586_s3, 512 }
   0x2   :  { %s23_s19 = sshll.u32 %s474_s18, 4  ;;  %p427_p0 = scmp.ne.s32.totalorder %s586_s3, %s426_s22  ;;  %s24_s19 = int_to_ptr.vmem [resolvable:$true] %s23_s19 }
   0x3   :  { %p430_p1 = scmp.lt.u32.totalorder %s426_s22, %s586_s3 }
   0x5   :  { %p432_p2 = pnand %p430_p1, %p427_p0 }
   0x7   :  { %435 = shalt.err (!%p432_p2)
}
   0x8   :  { %s436_s27 = scalar_lea.vmem %s24_s19, 512  ;;  %p441_p4 = scmp.lt.s32.totalorder %s24_s19, %s24_s19 }
   0x9   :  { %p437_p3 = scmp.ne.s32.totalorder %s24_s19, %s436_s27  ;;  %p442_p5 = scmp.lt.s32.totalorder %s436_s27, %s436_s27 }
   0xb   :  { %p443_p6 = por %p442_p5, %p441_p4 }
   0xd   :  { %p444_p7 = pnand %p443_p6, %p437_p3 }
   0xf   :  { %447 = shalt.err (!%p444_p7)
}
  0x10   :  { %s475_s28 = smov 128   ;;  %s476_s29 = smov 8  }
  0x11   :  { %29 = dma.hbm_to_vmem [thread:$0]  %s586_s3, 512, %s24_s19, [#allocation3], %s475_s28, %s475_s28, %s476_s29  }
  0x12   :  { %470 = dma.done.wait [#allocation3], 512  }
  0x13   :  { %471 = vsyncadd [#allocation3], 4294966784  ;;  %v477_v0 = vmov 0   ;;  %v478_v1 = vmov 2   ;;  %v35_v2 = vld [vmem:[%s583_s0] sm:$0xff]  ;;  %v479_v3 = vmov 1   ;;  %v48_v10 = vlaneseq }
  0x14   :  { %422 = vset.pattern.permute.xlu0 %v477_v0  ;;  %424 = vset.pattern.permute.xlu1 %v478_v1  ;;  %v38_v4 = vld [vmem:[#allocation2] sm:$0xff]  ;;  %v39_v5 = vld [vmem:[#allocation2 + $0x8] sm:$0xff]  ;;  %v40_v7 = vld [vmem:[#allocation2 + $0x10] sm:$0xff]  ;;  %vm135_vm0 = vcmask 261120   ;;  %v480_v31 = vmov 0.0  }
  0x15   :  { %45 = vperm.xlu0 %422, %v35_v2   ;;  %71 = vperm.xlu1 %424, %v35_v2   ;;  %v402_v6 = vpack.c.bf16 %v39_v5, %v38_v4  ;;  %v41_v8 = vld [vmem:[#allocation2 + $0x18] sm:$0xff]  ;;  %v49_v11 = vshrl.u32 %v48_v10, 7  ;;  %v36_v13 = vld [vmem:[%s584_s1] sm:$0x7] }
  0x16   :  { %v406_v9 = vpack.c.bf16 %v41_v8, %v40_v7  ;;  %v352_v21 = vld [vmem:[%s585_s2] ss:$0 sm:$0xff] }
  0x17   :  { %403 = vmatprep.subr.bf16.mxu0 %v402_v6  ;;  %410 = vmatprep.subr.bf16.mxu1 %v402_v6  ;;  %v50_v12 = vsub.s32 0, %v49_v11  ;;  %v66_v15 = vsub.s32 1, %v49_v11  ;;  %v76_v16 = vsub.s32 2, %v49_v11 }
  0x18   :  { %405 = vmatpush3.bf16.msra.mxu0 %v402_v6  ;;  %412 = vmatpush3.bf16.msra.mxu1 %v402_v6 }
  0x19   :  { %423 = vset.pattern.permute.xlu0 %v479_v3  ;;  %407 = vmatprep.subr.bf16.mxu0 %v406_v9  ;;  %v51_v14 = vrot.slane %v36_v13, %v50_v12  ;;  %v67_v19 = vrot.slane %v36_v13, %v66_v15  ;;  %v77_v20 = vrot.slane %v36_v13, %v76_v16 }
  0x1a   :  { %61 = vperm.xlu0 %423, %v35_v2   ;;  %411 = vmatprep.subr.bf16.mxu1 %v406_v9  ;;  %v353_v2 = vld [vmem:[%s587_s4] ss:$0 sm:$0xff]  ;;  %s481_s4 = smov [#allocation5]  }
  0x1b   :  { %s340_s11 = sshll.u32 %s481_s4, 4  ;;  %s341_s11 = int_to_ptr.vmem [resolvable:$true] %s340_s11 }
  0x1c   :  { %409 = vmatpush3.bf16.msra.mxu0 %v406_v9  ;;  %413 = vmatpush3.bf16.msra.mxu1 %v406_v9  ;;  %s448_s12 = scalar_lea.vmem %s341_s11, 256  ;;  %p453_p9 = scmp.lt.s32.totalorder %s341_s11, %s341_s11 }
  0x1d   :  { %p449_p8 = scmp.ne.s32.totalorder %s341_s11, %s448_s12  ;;  %p454_p10 = scmp.lt.s32.totalorder %s448_s12, %s448_s12 }
  0x1e   :  { %425 = vset.pattern.permute.xlu0 %v478_v1 }
  0x1f   :  { %p455_p11 = por %p454_p10, %p453_p9 }
  0x21   :  { %p456_p12 = pnand %p455_p11, %p449_p8 }
  0x94   :  { %v46_v17 = vpop.permute.xlu0 %45  ;;  %v72_v22 = vpop.permute.xlu1 %71 }
  0x95   :  { %v52_v18 = vmul.f32 %v51_v14, %v46_v17  ;;  %v78_v26 = vmul.f32 %v77_v20, %v72_v22 }
  0x97   :  { %v59_v24 = vadd.f32 %v352_v21, %v52_v18 }
  0x99   :  { %v62_v23 = vpop.permute.xlu0 %61 }
  0x9a   :  { %v68_v25 = vmul.f32 %v67_v19, %v62_v23 }
  0x9c   :  { %v69_v27 = vadd.f32 %v68_v25, %v59_v24 }
  0x9e   :  { %v79_v28 = vadd.f32 %v78_v26, %v69_v27 }
  0xa0   :  { %387 = vmatprep.mubr.msk.f32.mxu0 %vm135_vm0, %v79_v28  ;;  %v84_v29 = vmul.f32 0.5, %v79_v28  ;;  %vm86_vm1 = vcmp.gt.f32.partialorder %v79_v28, 15.0 }
  0xa1   :  { %v87_v32 = vsel %vm86_vm1, 15.0, %v480_v31 }
  0xa2   :  { %v85_v30 = vadd.f32 %v84_v29, %v79_v28 }
  0xa4   :  { %v88_v33 = vsub.f32 %v85_v30, %v87_v32 }
  0xa6   :  { %388 = vmatmul.mubr.msk.f32.vlgmr.msra.gmra.mrb[0].mxu0 %vm135_vm0, %v88_v33  ;;  %v89_v34 = vmul.f32 0.5, %v88_v33  ;;  %vm91_vm2 = vcmp.gt.f32.partialorder %v88_v33, 15.0 }
  0xa7   :  { %v92_v36 = vsel %vm91_vm2, 15.0, %v480_v31 }
  0xa8   :  { %v90_v35 = vadd.f32 %v89_v34, %v79_v28 }
  0xaa   :  { %v93_v37 = vsub.f32 %v90_v35, %v92_v36 }
  0xac   :  { %390 = vmatprep.mubr.msk.f32.mxu0 %vm135_vm0, %v93_v37  ;;  %v94_v38 = vmul.f32 0.5, %v93_v37  ;;  %vm96_vm3 = vcmp.gt.f32.partialorder %v93_v37, 15.0 }
  0xad   :  { %v97_v40 = vsel %vm96_vm3, 15.0, %v480_v31 }
  0xae   :  { %v95_v39 = vadd.f32 %v94_v38, %v79_v28 }
  0xb0   :  { %v98_v41 = vsub.f32 %v95_v39, %v97_v40 }
  0xb2   :  { %391 = vmatmul.mubr.msk.f32.gmra.mrb[2].mxu0 %vm135_vm0, %v98_v41  ;;  %v99_v42 = vmul.f32 0.5, %v98_v41  ;;  %vm101_vm4 = vcmp.gt.f32.partialorder %v98_v41, 15.0 }
  0xb3   :  { %v102_v44 = vsel %vm101_vm4, 15.0, %v480_v31 }
  0xb4   :  { %v100_v43 = vadd.f32 %v99_v42, %v79_v28 }
  0xb6   :  { %v103_v45 = vsub.f32 %v100_v43, %v102_v44 }
  0xb8   :  { %393 = vmatprep.mubr.msk.f32.mxu0 %vm135_vm0, %v103_v45  ;;  %v104_v46 = vmul.f32 0.5, %v103_v45  ;;  %vm106_vm5 = vcmp.gt.f32.partialorder %v103_v45, 15.0 }
  0xb9   :  { %v107_v48 = vsel %vm106_vm5, 15.0, %v480_v31 }
  0xba   :  { %v105_v47 = vadd.f32 %v104_v46, %v79_v28 }
  0xbc   :  { %v108_v49 = vsub.f32 %v105_v47, %v107_v48 }
  0xbe   :  { %394 = vmatmul.mubr.msk.f32.gmra.mrb[4].mxu0 %vm135_vm0, %v108_v49  ;;  %v109_v50 = vmul.f32 0.5, %v108_v49  ;;  %vm111_vm6 = vcmp.gt.f32.partialorder %v108_v49, 15.0 }
  0xbf   :  { %v112_v52 = vsel %vm111_vm6, 15.0, %v480_v31 }
  0xc0   :  { %v110_v51 = vadd.f32 %v109_v50, %v79_v28 }
  0xc2   :  { %v113_v53 = vsub.f32 %v110_v51, %v112_v52 }
  0xc4   :  { %v114_v54 = vmul.f32 0.5, %v113_v53  ;;  %vm116_vm7 = vcmp.gt.f32.partialorder %v113_v53, 15.0  ;;  %396 = vmatprep.mubr.msk.f32.mxu1 %vm135_vm0, %v113_v53 }
  0xc5   :  { %v117_v56 = vsel %vm116_vm7, 15.0, %v480_v31 }
  0xc6   :  { %v115_v55 = vadd.f32 %v114_v54, %v79_v28 }
  0xc8   :  { %v118_v57 = vsub.f32 %v115_v55, %v117_v56 }
  0xca   :  { %397 = vmatmul.mubr.msk.f32.vlgmr.msra.gmra.mrb[0].mxu1 %vm135_vm0, %v118_v57  ;;  %v119_v58 = vmul.f32 0.5, %v118_v57  ;;  %vm121_vm8 = vcmp.gt.f32.partialorder %v118_v57, 15.0 }
  0xcb   :  { %v122_v60 = vsel %vm121_vm8, 15.0, %v480_v31 }
  0xcc   :  { %v120_v59 = vadd.f32 %v119_v58, %v79_v28 }
  0xce   :  { %v123_v61 = vsub.f32 %v120_v59, %v122_v60 }
  0xd0   :  { %399 = vmatprep.mubr.msk.f32.mxu1 %vm135_vm0, %v123_v61  ;;  %v124_v62 = vmul.f32 0.5, %v123_v61  ;;  %vm126_vm9 = vcmp.gt.f32.partialorder %v123_v61, 15.0 }
  0xd1   :  { %v127_v0 = vsel %vm126_vm9, 15.0, %v480_v31 }
  0xd2   :  { %v125_v63 = vadd.f32 %v124_v62, %v79_v28 }
  0xd4   :  { %v128_v1 = vsub.f32 %v125_v63, %v127_v0 }
  0xd6   :  { %400 = vmatmul.mubr.msk.f32.gmra.mrb[2].mxu1 %vm135_vm0, %v128_v1 }
 0x179   :  { %v389_v3 = vpop.f32.mrb[0].mxu0 }
 0x17a   :  { %v232_v4 = vpop.f32.mrb[1].mxu0  ;;  %v238_v6 = vadd.f32 %v389_v3, %v353_v2 }
 0x17b   :  { %v233_v5 = vadd.f32 %v353_v2, %v232_v4 }
 0x17d   :  { %v285_v7 = vmul.f32 0.5, %v233_v5  ;;  %vm287_vm10 = vcmp.gt.f32.partialorder %v233_v5, 10.0 }
 0x17e   :  { %v288_v9 = vsel %vm287_vm10, 10.0, %v480_v31 }
 0x17f   :  { %v286_v8 = vadd.f32 %v285_v7, %v238_v6 }
 0x181   :  { %v289_v10 = vsub.f32 %v286_v8, %v288_v9 }
 0x183   :  { %v290_v14 = vmul.f32 0.5, %v289_v10  ;;  %vm292_vm11 = vcmp.gt.f32.partialorder %v289_v10, 10.0 }
 0x184   :  { %v293_v16 = vsel %vm292_vm11, 10.0, %v480_v31 }
 0x185   :  { %v392_v11 = vpop.f32.mrb[2].mxu0 }
 0x186   :  { %v242_v12 = vpop.f32.mrb[3].mxu0  ;;  %v248_v18 = vadd.f32 %v392_v11, %v353_v2 }
 0x187   :  { %v243_v13 = vadd.f32 %v353_v2, %v242_v12 }
 0x189   :  { %v291_v15 = vadd.f32 %v290_v14, %v243_v13 }
 0x18b   :  { %v294_v17 = vsub.f32 %v291_v15, %v293_v16 }
 0x18d   :  { %v295_v19 = vmul.f32 0.5, %v294_v17  ;;  %vm297_vm12 = vcmp.gt.f32.partialorder %v294_v17, 10.0 }
 0x18e   :  { %v298_v21 = vsel %vm297_vm12, 10.0, %v480_v31 }
 0x18f   :  { %v296_v20 = vadd.f32 %v295_v19, %v248_v18 }
 0x191   :  { %v395_v22 = vpop.f32.mrb[4].mxu0  ;;  %v299_v23 = vsub.f32 %v296_v20, %v298_v21 }
 0x192   :  { %v252_v24 = vpop.f32.mrb[5].mxu0  ;;  %v258_v30 = vadd.f32 %v395_v22, %v353_v2 }
 0x193   :  { %v253_v25 = vadd.f32 %v353_v2, %v252_v24  ;;  %v300_v26 = vmul.f32 0.5, %v299_v23  ;;  %vm302_vm13 = vcmp.gt.f32.partialorder %v299_v23, 10.0 }
 0x194   :  { %v303_v28 = vsel %vm302_vm13, 10.0, %v480_v31 }
 0x195   :  { %v301_v27 = vadd.f32 %v300_v26, %v253_v25 }
 0x197   :  { %v304_v29 = vsub.f32 %v301_v27, %v303_v28 }
 0x199   :  { %v305_v32 = vmul.f32 0.5, %v304_v29  ;;  %vm307_vm14 = vcmp.gt.f32.partialorder %v304_v29, 10.0 }
 0x19a   :  { %v308_v34 = vsel %vm307_vm14, 10.0, %v480_v31 }
 0x19b   :  { %v306_v33 = vadd.f32 %v305_v32, %v258_v30 }
 0x19d   :  { %v398_v35 = vpop.f32.mrb[0].mxu1  ;;  %v309_v36 = vsub.f32 %v306_v33, %v308_v34 }
 0x19e   :  { %v262_v37 = vpop.f32.mrb[1].mxu1  ;;  %v268_v43 = vadd.f32 %v398_v35, %v353_v2 }
 0x19f   :  { %v263_v38 = vadd.f32 %v353_v2, %v262_v37  ;;  %v310_v39 = vmul.f32 0.5, %v309_v36  ;;  %vm312_vm15 = vcmp.gt.f32.partialorder %v309_v36, 10.0 }
 0x1a0   :  { %v313_v41 = vsel %vm312_vm15, 10.0, %v480_v31 }
 0x1a1   :  { %v311_v40 = vadd.f32 %v310_v39, %v263_v38 }
 0x1a3   :  { %v314_v42 = vsub.f32 %v311_v40, %v313_v41 }
 0x1a5   :  { %v315_v44 = vmul.f32 0.5, %v314_v42  ;;  %vm317_vm0 = vcmp.gt.f32.partialorder %v314_v42, 10.0 }
 0x1a6   :  { %v318_v46 = vsel %vm317_vm0, 10.0, %v480_v31 }
 0x1a7   :  { %v316_v45 = vadd.f32 %v315_v44, %v268_v43 }
 0x1a9   :  { %v401_v47 = vpop.f32.mrb[2].mxu1  ;;  %v319_v48 = vsub.f32 %v316_v45, %v318_v46 }
 0x1aa   :  { %v272_v49 = vpop.f32.mrb[3].mxu1  ;;  %v278_v55 = vadd.f32 %v401_v47, %v353_v2 }
 0x1ab   :  { %v273_v50 = vadd.f32 %v353_v2, %v272_v49  ;;  %v320_v51 = vmul.f32 0.5, %v319_v48  ;;  %vm322_vm1 = vcmp.gt.f32.partialorder %v319_v48, 10.0 }
 0x1ac   :  { %v323_v53 = vsel %vm322_vm1, 10.0, %v480_v31 }
 0x1ad   :  { %v321_v52 = vadd.f32 %v320_v51, %v273_v50 }
 0x1af   :  { %v324_v54 = vsub.f32 %v321_v52, %v323_v53 }
 0x1b1   :  { %v325_v56 = vmul.f32 0.5, %v324_v54  ;;  %vm327_vm2 = vcmp.gt.f32.partialorder %v324_v54, 10.0 }
 0x1b2   :  { %v328_v58 = vsel %vm327_vm2, 10.0, %v480_v31 }
 0x1b3   :  { %v326_v57 = vadd.f32 %v325_v56, %v278_v55 }
 0x1b5   :  { %v329_v59 = vsub.f32 %v326_v57, %v328_v58 }
 0x1b7   :  { %vm330_vm3 = vcmp.gt.f32.partialorder %v329_v59, 10.0  ;;  %334 = vst [vmem:[#allocation5 + $0x8] sm:$0xff] %v329_v59 }
 0x1b8   :  { %v364_v60 = vsel %vm330_vm3, 1.0, %v480_v31 }
 0x1b9   :  { %333 = vst [vmem:[#allocation5] sm:$0xff] %v364_v60 }
 0x1ba   :  { %459 = shalt.err (!%p456_p12)
}
 0x1bb   :  { %s460_s15 = scalar_lea.hbm %s588_s5, 256 }
 0x1bc   :  { %p461_p13 = scmp.ne.s32.totalorder %s588_s5, %s460_s15  ;;  %p464_p0 = scmp.lt.u32.totalorder %s460_s15, %s588_s5 }
 0x1be   :  { %p466_p1 = pnand %p464_p0, %p461_p13 }
 0x1c0   :  { %469 = shalt.err (!%p466_p1)
}
 0x1c1   :  { %346 = dma.vmem_to_hbm [thread:$0]  %s341_s11, 256, %s588_s5, [#allocation4], %s475_s28, %s475_s28, %s476_s29  }
 0x1c2   :  { %472 = dma.done.wait [#allocation4], 256  }
 0x1c3   :  { %473 = vsyncadd [#allocation4], 4294967040 }
 0x1c4   :  { %350 = vsyncpa [#allocation3], 1 }
 0x1c5   :  { %351 = vsyncpa [#allocation4], 1 }

</bundles_post_ra>
